<compile_context>
chip_gen: v7x
topology: tpu7x:2x2x1
jax: 0.10.0
libtpu: 0.0.40
codegen_flags: <defaults>
</compile_context>

<pallas_src>
import math

import jax
import jax.numpy as jnp
from jax.experimental import pallas as pl
from jax.experimental.pallas import tpu as pltpu


def _scale_kernel(param_ref, w_ref, b_ref, x_ref, o_ref):
    """One lane-dense tile of  x * softplus(param @ w.T + b).

    param_ref : (1, P)   learned parameter (resident across grid steps)
    w_ref     : (1, P)   Linear(P, 1) weight
    b_ref     : (1, 1)   Linear(P, 1) bias
    x_ref     : (BR, W)  input tile
    o_ref     : (BR, W)  output tile
    """
    pw = param_ref[...].astype(jnp.float32) * w_ref[...].astype(jnp.float32)   # (1, P)
    z = jnp.sum(pw, axis=-1, keepdims=True) + b_ref[...].astype(jnp.float32)   # (1, 1)
    # Numerically stable softplus: log(1 + e^z) = max(z, 0) + log(1 + e^{-|z|})
    scale = jnp.maximum(z, 0.0) + jnp.log(1.0 + jnp.exp(-jnp.abs(z)))          # (1, 1)
    o_ref[...] = (x_ref[...].astype(jnp.float32) * scale).astype(o_ref.dtype)


def _round_up(n, m):
    return ((n + m - 1) // m) * m


def scale_forward(x, param, weight, bias, *, block_rows=512, lane_width=512):
    """Pallas TPU forward of `Scale`: x * softplus(param @ weight.T + bias).

    param : (1, P)   weight : (1, P)  (nn.Linear(P, 1).weight)   bias : (1,)
    """
    P = param.shape[-1]
    param2 = param.reshape(1, P)
    w2 = weight.reshape(1, P)
    b2 = jnp.asarray(bias, jnp.float32).reshape(1, 1)

    orig_shape = x.shape
    total = int(x.size)

    use_fast_path = (
        x.ndim >= 2
        and x.shape[-1] % 128 == 0
        and (total // x.shape[-1]) % 8 == 0
    )

    if use_fast_path:
        # View x directly as a lane-dense (rows, W) slab: no padding, no copy.
        W = x.shape[-1]
        rows = total // W
        x2 = x.reshape(rows, W)
        BR = min(block_rows, rows)
        if rows % BR:
            BR = math.gcd(rows, BR)      # 8 | rows and 8 | block_rows  =>  8 | BR
        pad = 0
    else:
        # General path: flatten and pad once to a lane-dense slab.
        W = lane_width
        rows_needed = pl.cdiv(total, W)
        BR = min(block_rows, max(8, _round_up(rows_needed, 8)))
        rows = _round_up(max(rows_needed, 1), BR)
        pad = rows * W - total
        x2 = jnp.pad(x.reshape(-1), (0, pad)).reshape(rows, W)

    grid = (rows // BR,)
    out2 = pl.pallas_call(
        _scale_kernel,
        out_shape=jax.ShapeDtypeStruct((rows, W), x.dtype),
        grid_spec=pltpu.PrefetchScalarGridSpec(
            num_scalar_prefetch=0,
            grid=grid,
            in_specs=[
                pl.BlockSpec((1, P), lambda i: (0, 0)),    # param (resident)
                pl.BlockSpec((1, P), lambda i: (0, 0)),    # weight (resident)
                pl.BlockSpec((1, 1), lambda i: (0, 0)),    # bias (resident)
                pl.BlockSpec((BR, W), lambda i: (i, 0)),   # input tile
            ],
            out_specs=pl.BlockSpec((BR, W), lambda i: (i, 0)),
        ),
        compiler_params=pltpu.CompilerParams(
            dimension_semantics=("parallel",)),
    )(param2, w2, b2, x2)

    if pad:
        return out2.reshape(-1)[:total].reshape(orig_shape)
    return out2.reshape(orig_shape)


def scale_ref(x, param, weight, bias):
    """Pure-JAX reference mirroring the PyTorch forward exactly."""
    z = param @ weight.T + bias                       # (1, 1)
    return x * jax.nn.softplus(z)[0, 0]


if __name__ == "__main__":
    P = 128  # param_dim (module default is 1024; small shape for the demo)

    key = jax.random.PRNGKey(0)
    kp, kw, kx1, kx2 = jax.random.split(key, 4)

    # Module init: param ~ randn(1, P); projection = init_selu(Linear(P, 1))
    # => lecun-normal weight (std = 1/sqrt(fan_in)), zero bias.
    param = jax.random.normal(kp, (1, P), dtype=jnp.float32)
    weight = jax.random.normal(kw, (1, P), dtype=jnp.float32) * (P ** -0.5)
    bias = jnp.zeros((1,), dtype=jnp.float32)

    # Lane-dense input (fast path, no padding) and an awkwardly-shaped input
    # (general padded path).
    x_fast = jax.random.normal(kx1, (2, 8, 256), dtype=jnp.float32)
    x_gen = jax.random.normal(kx2, (2, 4, 16, 16), dtype=jnp.float32)

    for x in (x_fast, x_gen):
        out = jax.block_until_ready(scale_forward(x, param, weight, bias))
        ref = scale_ref(x, param, weight, bias)
        assert out.shape == x.shape, (out.shape, x.shape)
        assert jnp.allclose(out, ref, atol=1e-5, rtol=1e-5), "mismatch vs reference"

    print("KERNEL_OK")
</pallas_src>

<mosaic_0001>
module attributes {stable_mosaic.version = 11 : i64} {
  func.func @_scale_kernel(%arg0: i32, %arg1: memref<1x128xf32, #tpu.memory_space<vmem>>, %arg2: memref<1x128xf32, #tpu.memory_space<vmem>>, %arg3: memref<1x1xf32, #tpu.memory_space<vmem>>, %arg4: memref<16x256xf32, #tpu.memory_space<vmem>>, %arg5: memref<16x256xf32, #tpu.memory_space<vmem>>) attributes {dimension_semantics = [#tpu.dimension_semantics<parallel>], iteration_bounds = array<i64: 1>, scalar_prefetch = 0 : i64, scratch_operands = 0 : i64, tpu.core_type = #tpu.core_type<tc>, window_params = [{pipeline_mode = #tpu.pipeline_mode<synchronous>, transform_indices = @transform_0, window_bounds = array<i64: 1, 128>}, {pipeline_mode = #tpu.pipeline_mode<synchronous>, transform_indices = @transform_1, window_bounds = array<i64: 1, 128>}, {pipeline_mode = #tpu.pipeline_mode<synchronous>, transform_indices = @transform_2, window_bounds = array<i64: 1, 1>}, {transform_indices = @transform_3, window_bounds = array<i64: 16, 256>}, {transform_indices = @transform_4, window_bounds = array<i64: 16, 256>}]} {
    %c0 = arith.constant 0 : index
    %c0_0 = arith.constant 0 : index
    %0 = vector.load %arg1[%c0, %c0_0] : memref<1x128xf32, #tpu.memory_space<vmem>>, vector<1x128xf32>
    %c0_1 = arith.constant 0 : index
    %c0_2 = arith.constant 0 : index
    %1 = vector.load %arg2[%c0_1, %c0_2] : memref<1x128xf32, #tpu.memory_space<vmem>>, vector<1x128xf32>
    %2 = arith.mulf %0, %1 : vector<1x128xf32>
    %cst = arith.constant dense<0.000000e+00> : vector<1xf32>
    %3 = vector.multi_reduction <add>, %2, %cst [1] : vector<1x128xf32> to vector<1xf32>
    %4 = vector.shape_cast %3 : vector<1xf32> to vector<1x1xf32>
    %c0_3 = arith.constant 0 : index
    %c0_4 = arith.constant 0 : index
    %5 = vector.load %arg3[%c0_3, %c0_4] : memref<1x1xf32, #tpu.memory_space<vmem>>, vector<1x1xf32>
    %6 = arith.addf %4, %5 : vector<1x1xf32>
    %cst_5 = arith.constant 0.000000e+00 : f32
    %7 = vector.broadcast %cst_5 : f32 to vector<1x1xf32>
    %8 = arith.maximumf %6, %7 : vector<1x1xf32>
    %9 = math.absf %6 : vector<1x1xf32>
    %cst_6 = arith.constant 0.000000e+00 : f32
    %10 = vector.broadcast %cst_6 : f32 to vector<1x1xf32>
    %11 = arith.subf %10, %9 : vector<1x1xf32>
    %12 = math.exp %11 : vector<1x1xf32>
    %cst_7 = arith.constant 1.000000e+00 : f32
    %13 = vector.broadcast %cst_7 : f32 to vector<1x1xf32>
    %14 = arith.addf %13, %12 : vector<1x1xf32>
    %15 = math.log %14 : vector<1x1xf32>
    %16 = arith.addf %8, %15 : vector<1x1xf32>
    %c0_8 = arith.constant 0 : index
    %c0_9 = arith.constant 0 : index
    %17 = vector.load %arg4[%c0_8, %c0_9] : memref<16x256xf32, #tpu.memory_space<vmem>>, vector<16x256xf32>
    %18 = vector.broadcast %16 : vector<1x1xf32> to vector<16x256xf32>
    %19 = arith.mulf %17, %18 : vector<16x256xf32>
    %c0_10 = arith.constant 0 : index
    %c0_11 = arith.constant 0 : index
    %20 = vector.load %arg5[%c0_10, %c0_11] : memref<16x256xf32, #tpu.memory_space<vmem>>, vector<16x256xf32>
    tpu.vector_store %arg5[%c0_10, %c0_11], %19 {strides = array<i32>} : memref<16x256xf32, #tpu.memory_space<vmem>>, vector<16x256xf32>,
    return
  }
  func.func @transform_0(%arg0: i32) -> (i32, i32) {
    %c0_i32 = arith.constant 0 : i32
    %c0_i32_0 = arith.constant 0 : i32
    %c0_i32_1 = arith.constant 0 : i32
    return %c0_i32, %c0_i32_0 : i32, i32
  }
  func.func @transform_1(%arg0: i32) -> (i32, i32) {
    %c0_i32 = arith.constant 0 : i32
    %c0_i32_0 = arith.constant 0 : i32
    %c0_i32_1 = arith.constant 0 : i32
    return %c0_i32, %c0_i32_0 : i32, i32
  }
  func.func @transform_2(%arg0: i32) -> (i32, i32) {
    %c0_i32 = arith.constant 0 : i32
    %c0_i32_0 = arith.constant 0 : i32
    %c0_i32_1 = arith.constant 0 : i32
    return %c0_i32, %c0_i32_0 : i32, i32
  }
  func.func @transform_3(%arg0: i32) -> (i32, i32) {
    %c0_i32 = arith.constant 0 : i32
    %c0_i32_0 = arith.constant 0 : i32
    return %arg0, %c0_i32 : i32, i32
  }
  func.func @transform_4(%arg0: i32) -> (i32, i32) {
    %c0_i32 = arith.constant 0 : i32
    %c0_i32_0 = arith.constant 0 : i32
    return %arg0, %c0_i32 : i32, i32
  }
}

</mosaic_0001>

<bundles_post_ra>
// kernel: tpu_custom_call.1
= control target key start
LH: loop header
LB: loop body
LE: loop exit
PB: predicated region body
PF: predicated region fallthrough
CT: control target
= control target key end

     0   :  { %s211_s0 = inlined_call_operand.vmem [shape: f32[1,128], index: 0, kind: input, shape index: {}]   ;;  %s212_s1 = inlined_call_operand.vmem [shape: f32[1,128], index: 1, kind: input, shape index: {}]   ;;  %s213_s2 = inlined_call_operand.<no memory space> [shape: f32[1,1], index: 2, kind: input, shape index: {}]   ;;  %s214_s3 = inlined_call_operand.hbm [shape: f32[16,256], index: 3, kind: input, shape index: {}]   ;;  %s215_s4 = inlined_call_operand.hbm [shape: f32[16,256], index: 4, kind: output, shape index: {}]  }
   0x1   :  { %v9_v0 = vstv %s213_s2 }
   0x2   :  { %10 = vst [vmem:[#allocation2] sm:$0x1] %v9_v0 }
   0x3   :  { %11 = vsyncpa [#allocation4], 0 }
   0x4   :  { %12 = vsyncpa [#allocation5], 0  ;;  %s143_s17 = smov [#allocation3]   ;;  %s95_s21 = scalar_lea.hbm %s214_s3, 512 }
   0x5   :  { %s24_s18 = sshll.u32 %s143_s17, 4  ;;  %p96_p0 = scmp.ne.s32.totalorder %s214_s3, %s95_s21  ;;  %s25_s18 = int_to_ptr.vmem [resolvable:$true] %s24_s18 }
   0x6   :  { %p99_p1 = scmp.lt.u32.totalorder %s95_s21, %s214_s3 }
   0x8   :  { %p101_p2 = pnand %p99_p1, %p96_p0 }
   0xa   :  { %104 = shalt.err (!%p101_p2)
}
   0xb   :  { %s105_s2 = scalar_lea.vmem %s25_s18, 512  ;;  %p110_p4 = scmp.lt.s32.totalorder %s25_s18, %s25_s18 }
   0xc   :  { %p106_p3 = scmp.ne.s32.totalorder %s25_s18, %s105_s2  ;;  %p111_p5 = scmp.lt.s32.totalorder %s105_s2, %s105_s2 }
   0xe   :  { %p112_p6 = por %p111_p5, %p110_p4 }
  0x10   :  { %p113_p7 = pnand %p112_p6, %p106_p3 }
  0x12   :  { %116 = shalt.err (!%p113_p7)
}
  0x13   :  { %s144_s26 = smov 256   ;;  %s145_s27 = smov 16  }
  0x14   :  { %30 = dma.hbm_to_vmem [thread:$0]  %s214_s3, 512, %s25_s18, [#allocation4], %s144_s26, %s144_s26, %s145_s27  }
  0x15   :  { %139 = dma.done.wait [#allocation4], 512  }
  0x16   :  { %140 = vsyncadd [#allocation4], 4294966784  ;;  %v34_v1 = vld [vmem:[%s211_s0] sm:$0x1]  ;;  %vm37_vm0 = vcmask 1040384   ;;  %v52_v17 = vld [vmem:[#allocation3] sm:$0xff] }
  0x17   :  { %v35_v2 = vld [vmem:[%s212_s1] sm:$0x1]  ;;  %v53_v18 = vld [vmem:[#allocation3 + $0x8] sm:$0xff]  ;;  %v54_v19 = vld [vmem:[#allocation3 + $0x10] sm:$0xff]  ;;  %s146_s0 = smov [#allocation6]  }
  0x18   :  { %v36_v3 = vmul.f32 %v35_v2, %v34_v1  ;;  %v41_v5 = vld [vmem:[#allocation2] sm:$0x1]  ;;  %s73_s1 = sshll.u32 %s146_s0, 4  ;;  %s74_s1 = int_to_ptr.vmem [resolvable:$true] %s73_s1 }
  0x19   :  { %v55_v20 = vld [vmem:[#allocation3 + $0x18] sm:$0xff]  ;;  %s117_s8 = scalar_lea.vmem %s74_s1, 512  ;;  %p122_p9 = scmp.lt.s32.totalorder %s74_s1, %s74_s1 }
  0x1a   :  { %v38_v4 = vsel %vm37_vm0, %v36_v3, 0.0  ;;  %p118_p8 = scmp.ne.s32.totalorder %s74_s1, %s117_s8  ;;  %p123_p10 = scmp.lt.s32.totalorder %s117_s8, %s117_s8 }
  0x1b   :  { %39 = vadd.xlane.f32.xlu0 %v38_v4 }
  0x1c   :  { %p124_p11 = por %p123_p10, %p122_p9 }
  0x1e   :  { %p125_p12 = pnand %p124_p11, %p118_p8 }
  0xa8   :  { %v40_v6 = vpop.xlane.xlu0 %39 }
  0xa9   :  { %v42_v7 = vadd.f32 %v41_v5, %v40_v6 }
  0xab   :  { %v44_v8 = vand.u32 2147483647, %v42_v7  ;;  %v43_v14 = vmax.f32 %v42_v7, 0.0 }
  0xad   :  { %v45_v9 = vsub.f32 0.0, %v44_v8 }
  0xaf   :  { %v46_v10 = vmul.f32 1.442695, %v45_v9 }
  0xb1   :  { %91 = vpow2.f32 %v46_v10 }
  0xbb   :  { %v92_v11 = vpop.eup %91 }
  0xbc   :  { %v48_v12 = vadd.f32 1.0, %v92_v11 }
  0xbe   :  { %93 = vlog2.f32 %v48_v12 }
  0xc8   :  { %v94_v13 = vpop.eup %93 }
  0xc9   :  { %v50_v15 = vmul.f32 0.6931472, %v94_v13 }
  0xcb   :  { %v51_v16 = vadd.f32 %v50_v15, %v43_v14 }
  0xcd   :  { %85 = vpush %v51_v16 }
  0xfe   :  { %s86_s3 = spop %85 }
  0xff   :  { %v58_v21 = vstv %s86_s3 }
 0x100   :  { %v60_v22 = vmul.f32 %v58_v21, %v52_v17  ;;  %v61_v23 = vmul.f32 %v58_v21, %v53_v18  ;;  %v62_v24 = vmul.f32 %v58_v21, %v54_v19  ;;  %v63_v25 = vmul.f32 %v58_v21, %v55_v20 }
 0x102   :  { %64 = vst [vmem:[#allocation6] sm:$0xff] %v60_v22  ;;  %65 = vst [vmem:[#allocation6 + $0x8] sm:$0xff] %v61_v23 }
 0x103   :  { %66 = vst [vmem:[#allocation6 + $0x10] sm:$0xff] %v62_v24  ;;  %67 = vst [vmem:[#allocation6 + $0x18] sm:$0xff] %v63_v25 }
 0x104   :  { %128 = shalt.err (!%p125_p12)
}
 0x105   :  { %s129_s11 = scalar_lea.hbm %s215_s4, 512 }
 0x106   :  { %p130_p13 = scmp.ne.s32.totalorder %s215_s4, %s129_s11  ;;  %p133_p0 = scmp.lt.u32.totalorder %s129_s11, %s215_s4 }
 0x108   :  { %p135_p1 = pnand %p133_p0, %p130_p13 }
 0x10a   :  { %138 = shalt.err (!%p135_p1)
}
 0x10b   :  { %79 = dma.vmem_to_hbm [thread:$0]  %s74_s1, 512, %s215_s4, [#allocation5], %s144_s26, %s144_s26, %s145_s27  }
 0x10c   :  { %141 = dma.done.wait [#allocation5], 512  }
 0x10d   :  { %142 = vsyncadd [#allocation5], 4294966784 }
 0x10e   :  { %83 = vsyncpa [#allocation4], 1 }
 0x10f   :  { %84 = vsyncpa [#allocation5], 1 }

</bundles_post_ra>
